<compile_context>
chip_gen: v7x
topology: tpu7x:2x2x1
jax: 0.10.0
libtpu: 0.0.40
codegen_flags: <defaults>
</compile_context>

<pallas_src>
import functools

import jax
import jax.numpy as jnp
from jax.experimental import pallas as pl
from jax.experimental.pallas import tpu as pltpu


_VMEM_LIMIT = 48 * 1024 * 1024  # fits v7x's 64 MiB VMEM with headroom; > v5e/v6e defaults


def _pick_tile(dim, candidates):
    """Largest candidate that divides `dim`; else the full dim (never drops remainder)."""
    for c in candidates:
        if dim % c == 0:
            return c
    return dim


# --------------------------------------------------------------------------- #
# Tiled matmul kernel:  out = x @ w   (w already stored as [K, N], bf16)
# --------------------------------------------------------------------------- #
def _matmul_kernel(x_ref, w_ref, o_ref, acc_ref):
    @pl.when(pl.program_id(2) == 0)
    def _():
        acc_ref[...] = jnp.zeros_like(acc_ref)

    acc_ref[...] += jnp.dot(
        x_ref[...], w_ref[...], preferred_element_type=jnp.float32
    )

    @pl.when(pl.program_id(2) == pl.num_programs(2) - 1)
    def _():
        o_ref[...] = acc_ref[...].astype(o_ref.dtype)


def pallas_matmul(x, w, *, out_dtype=None, tm=None, tn=None, tk=None):
    M, K = x.shape
    K2, N = w.shape
    assert K == K2
    out_dtype = x.dtype if out_dtype is None else out_dtype
    tm = _pick_tile(M, (256, 128, 64, 32, 16, 8)) if tm is None else tm
    tn = _pick_tile(N, (512, 256, 128)) if tn is None else tn
    tk = _pick_tile(K, (512, 256, 128)) if tk is None else tk
    assert M % tm == 0 and N % tn == 0 and K % tk == 0, (M, N, K, tm, tn, tk)
    grid = (M // tm, N // tn, K // tk)
    return pl.pallas_call(
        _matmul_kernel,
        out_shape=jax.ShapeDtypeStruct((M, N), out_dtype),
        grid_spec=pltpu.PrefetchScalarGridSpec(
            num_scalar_prefetch=0,
            grid=grid,
            in_specs=[
                pl.BlockSpec((tm, tk), lambda i, j, k: (i, k)),
                pl.BlockSpec((tk, tn), lambda i, j, k: (k, j)),
            ],
            out_specs=pl.BlockSpec((tm, tn), lambda i, j, k: (i, j)),
            scratch_shapes=[pltpu.VMEM((tm, tn), jnp.float32)],
        ),
        compiler_params=pltpu.CompilerParams(
            dimension_semantics=("parallel", "parallel", "arbitrary"),
            vmem_limit_bytes=_VMEM_LIMIT,
        ),
    )(x, w)


# --------------------------------------------------------------------------- #
# Rotary embedding kernel (rotate-half / NeoX style)
#   x_heads    : [n_heads, T, D]  (bf16)
#   cos_full   : [T, D]  = concat(cos, cos)      (f32)
#   sin_signed : [T, D]  = concat(-sin, sin)     (f32)
#   out = x * cos_full + rotate_half(x) * sin_signed
# --------------------------------------------------------------------------- #
def _rotary_kernel(x_ref, cos_ref, sin_ref, o_ref, *, use_roll):
    x = x_ref[0].astype(jnp.float32)        # [tt, D]
    d = x.shape[-1]
    if use_roll:
        # lane rotation on the XLU slot; shift by D//2 == symmetric roll.
        x_rot = pltpu.roll(x, shift=d // 2, axis=-1)
    else:
        d2 = d // 2
        x_rot = jnp.concatenate([x[:, d2:], x[:, :d2]], axis=-1)
    o_ref[0] = (x * cos_ref[...] + x_rot * sin_ref[...]).astype(o_ref.dtype)


def apply_rotary(x_heads, cos_full, sin_signed, *, tt=None):
    n, T, D = x_heads.shape
    tt = _pick_tile(T, (512, 256, 128)) if tt is None else tt
    use_roll = (D % 128 == 0)
    kernel = functools.partial(_rotary_kernel, use_roll=use_roll)
    return pl.pallas_call(
        kernel,
        out_shape=jax.ShapeDtypeStruct((n, T, D), x_heads.dtype),
        grid=(n, T // tt),
        in_specs=[
            pl.BlockSpec((1, tt, D), lambda h, t: (h, t, 0)),
            pl.BlockSpec((tt, D), lambda h, t: (t, 0)),
            pl.BlockSpec((tt, D), lambda h, t: (t, 0)),
        ],
        out_specs=pl.BlockSpec((1, tt, D), lambda h, t: (h, t, 0)),
        compiler_params=pltpu.CompilerParams(
            dimension_semantics=("parallel", "parallel"),
        ),
    )(x_heads, cos_full, sin_signed)


# --------------------------------------------------------------------------- #
# Variable-length causal flash attention (online softmax, GQA aware)
#   grid = (num_heads, T//tq, T//tk);  kv axis is the (arbitrary) reduction axis.
#   seg_q : [T, 1] int32 ; seg_k : [1, T] int32 (segment id per token)
#   q : [nH, T, D] ; k, v : [nKV, T, D]   (bf16)
# --------------------------------------------------------------------------- #
def _flash_attn_kernel(seg_q_ref, seg_k_ref, q_ref, k_ref, v_ref, o_ref,
                       m_sc, l_sc, acc_sc, *, scale, tq, tk):
    qi = pl.program_id(1)
    kv = pl.program_id(2)

    @pl.when(kv == 0)
    def _():
        m_sc[...] = jnp.full_like(m_sc, -jnp.inf)
        l_sc[...] = jnp.zeros_like(l_sc)
        acc_sc[...] = jnp.zeros_like(acc_sc)

    # Causal tile skip: only touch KV tiles that can contain col <= row.
    @pl.when(kv * tk < (qi + 1) * tq)
    def _():
        q = q_ref[0]                                   # [tq, D] bf16
        k = k_ref[0]                                   # [tk, D] bf16
        v = v_ref[0]                                   # [tk, D] bf16

        s = jax.lax.dot_general(
            q, k, (((1,), (1,)), ((), ())),
            preferred_element_type=jnp.float32,
        ) * scale                                      # [tq, tk] f32

        row = qi * tq + jax.lax.broadcasted_iota(jnp.int32, (tq, tk), 0)
        col = kv * tk + jax.lax.broadcasted_iota(jnp.int32, (tq, tk), 1)
        mask = (seg_q_ref[...] == seg_k_ref[...]) & (col <= row)
        s = jnp.where(mask, s, -1e30)

        m_prev = m_sc[...]                             # [tq, 1]
        m_new = jnp.maximum(m_prev, jnp.max(s, axis=-1, keepdims=True))
        alpha = jnp.exp(m_prev - m_new)
        p = jnp.exp(s - m_new)                         # [tq, tk] f32

        l_sc[...] = alpha * l_sc[...] + jnp.sum(p, axis=-1, keepdims=True)
        acc_sc[...] = alpha * acc_sc[...] + jnp.dot(
            p.astype(v.dtype), v, preferred_element_type=jnp.float32
        )
        m_sc[...] = m_new

    @pl.when(kv == pl.num_programs(2) - 1)
    def _():
        inv_l = pl.reciprocal(l_sc[...], approx=True)
        o_ref[0] = (acc_sc[...] * inv_l).astype(o_ref.dtype)


def flash_attention(q_heads, k_heads, v_heads, seg_ids, scale, *, tq=None, tk=None):
    nH, T, D = q_heads.shape
    nKV = k_heads.shape[0]
    group = nH // nKV
    # 256-aligned KV tiles feed the v6e/v7x 2x256 MXU fully; fall back cleanly.
    tq = _pick_tile(T, (256, 128)) if tq is None else tq
    tk = _pick_tile(T, (256, 128)) if tk is None else tk
    assert T % tq == 0 and T % tk == 0

    seg_q = seg_ids.reshape(T, 1).astype(jnp.int32)
    seg_k = seg_ids.reshape(1, T).astype(jnp.int32)
    kernel = functools.partial(_flash_attn_kernel, scale=scale, tq=tq, tk=tk)

    return pl.pallas_call(
        kernel,
        out_shape=jax.ShapeDtypeStruct((nH, T, D), q_heads.dtype),
        grid_spec=pltpu.PrefetchScalarGridSpec(
            num_scalar_prefetch=0,
            grid=(nH, T // tq, T // tk),
            in_specs=[
                pl.BlockSpec((tq, 1), lambda h, qi, kv: (qi, 0)),
                pl.BlockSpec((1, tk), lambda h, qi, kv: (0, kv)),
                pl.BlockSpec((1, tq, D), lambda h, qi, kv: (h, qi, 0)),
                pl.BlockSpec((1, tk, D), lambda h, qi, kv: (h // group, kv, 0)),
                pl.BlockSpec((1, tk, D), lambda h, qi, kv: (h // group, kv, 0)),
            ],
            out_specs=pl.BlockSpec((1, tq, D), lambda h, qi, kv: (h, qi, 0)),
            scratch_shapes=[
                pltpu.VMEM((tq, 1), jnp.float32),   # running max m
                pltpu.VMEM((tq, 1), jnp.float32),   # running denom l
                pltpu.VMEM((tq, D), jnp.float32),   # running accumulator
            ],
        ),
        compiler_params=pltpu.CompilerParams(
            dimension_semantics=("parallel", "parallel", "arbitrary"),
            vmem_limit_bytes=_VMEM_LIMIT,
        ),
    )(seg_q, seg_k, q_heads, k_heads, v_heads)


# --------------------------------------------------------------------------- #
# Module wrapper
# --------------------------------------------------------------------------- #
class FlashLlamaAttentionPallas:
    def __init__(self, hidden_size, num_heads, num_key_value_heads, key):
        assert hidden_size % num_heads == 0
        self.hidden_size = hidden_size
        self.num_heads = num_heads
        self.num_key_value_heads = num_key_value_heads
        self.head_size = hidden_size // num_heads
        self.softmax_scale = self.head_size ** (-0.5)

        k1, k2 = jax.random.split(key)
        qkv_out = (num_heads + 2 * num_key_value_heads) * self.head_size
        # Weights stored pre-transposed ([K, N]) and in bf16 (MXU-native dtype).
        w_qkv = (jax.random.normal(k1, (qkv_out, hidden_size), jnp.float32)
                 * hidden_size ** -0.5)
        w_o = (jax.random.normal(k2, (hidden_size, num_heads * self.head_size),
                                 jnp.float32)
               * (num_heads * self.head_size) ** -0.5)
        self.w_qkv_t = jnp.asarray(w_qkv.T, dtype=jnp.bfloat16)   # [hidden, qkv_out]
        self.w_o_t = jnp.asarray(w_o.T, dtype=jnp.bfloat16)       # [nH*D, hidden]

    def forward(self, hidden_states, cos, sin, cu_seqlens, max_s):
        T = hidden_states.shape[0]
        nH, nKV, D = self.num_heads, self.num_key_value_heads, self.head_size

        x = hidden_states.astype(jnp.bfloat16)

        # ---- QKV projection (tiled Pallas matmul, bf16 in / f32 acc) ----
        qkv = pallas_matmul(x, self.w_qkv_t, out_dtype=jnp.bfloat16)  # [T,(nH+2nKV)*D]
        q = qkv[:, : nH * D].reshape(T, nH, D)
        kv = qkv[:, nH * D:].reshape(T, 2, nKV, D)

        # heads-major layout for rotary / attention kernels (D on lanes, T on sublanes)
        q_h = jnp.transpose(q, (1, 0, 2))                          # [nH , T, D]
        k_h = jnp.transpose(kv[:, 0], (1, 0, 2))                   # [nKV, T, D]
        v_h = jnp.transpose(kv[:, 1], (1, 0, 2))                   # [nKV, T, D]

        # ---- rotary embedding (full-D tables, roll-based kernel) ----
        c = cos.reshape(T, D // 2).astype(jnp.float32)
        s = sin.reshape(T, D // 2).astype(jnp.float32)
        cos_full = jnp.concatenate([c, c], axis=-1)                # [T, D]
        sin_signed = jnp.concatenate([-s, s], axis=-1)             # [T, D]
        q_h = apply_rotary(q_h, cos_full, sin_signed)
        k_h = apply_rotary(k_h, cos_full, sin_signed)

        # layer_past[...] = kv  (prefill cache write; k already rotated, as in torch)
        layer_past = jnp.stack(
            [jnp.transpose(k_h, (1, 0, 2)), jnp.transpose(v_h, (1, 0, 2))], axis=1
        )                                                          # [T, 2, nKV, D]

        # segment ids from cu_seqlens (token i -> its sequence index)
        tok = jnp.arange(T, dtype=jnp.int32)
        seg_ids = jnp.sum(tok[:, None] >= cu_seqlens[None, 1:], axis=1).astype(jnp.int32)

        # ---- flash attention (tiled online-softmax Pallas kernel) ----
        attn = flash_attention(q_h, k_h, v_h, seg_ids, self.softmax_scale)  # [nH,T,D]
        attn_tok = jnp.transpose(attn, (1, 0, 2)).reshape(T, nH * D)

        # ---- output projection ----
        out = pallas_matmul(attn_tok, self.w_o_t, out_dtype=jnp.float32)    # [T, hidden]
        return out, layer_past


# --------------------------------------------------------------------------- #
# Pure-JAX reference for verification (f32, same bf16-rounded weights / inputs)
# --------------------------------------------------------------------------- #
def reference_forward(hs, w_qkv_t, w_o_t, cos_full, sin_signed, seg_ids,
                      nH, nKV, D, scale):
    T = hs.shape[0]
    x = hs.astype(jnp.bfloat16).astype(jnp.float32)
    wq = w_qkv_t.astype(jnp.float32)
    wo = w_o_t.astype(jnp.float32)

    qkv = x @ wq
    q = qkv[:, : nH * D].reshape(T, nH, D)
    kv = qkv[:, nH * D:].reshape(T, 2, nKV, D)

    cf = cos_full.reshape(T, 1, D)
    sf = sin_signed.reshape(T, 1, D)

    def rot(t):
        d2 = D // 2
        t_rot = jnp.concatenate([t[..., d2:], t[..., :d2]], axis=-1)
        return t * cf + t_rot * sf

    q = rot(q)
    k = rot(kv[:, 0])
    v = kv[:, 1]
    group = nH // nKV
    k_full = jnp.repeat(k, group, axis=1)
    v_full = jnp.repeat(v, group, axis=1)
    scores = jnp.einsum("thd,shd->hts", q, k_full) * scale
    idx = jnp.arange(T)
    mask = (seg_ids[:, None] == seg_ids[None, :]) & (idx[None, :] <= idx[:, None])
    scores = jnp.where(mask[None], scores, -1e30)
    p = jax.nn.softmax(scores, axis=-1)
    o = jnp.einsum("hts,shd->thd", p, v_full).reshape(T, nH * D)
    return o @ wo


# --------------------------------------------------------------------------- #
if __name__ == "__main__":
    key = jax.random.PRNGKey(0)
    k_hs, k_mod = jax.random.split(key)

    # 2 sequences (256 + 128 tokens) -> exercises multi-tile online softmax,
    # causal tile skip and fully-masked (cross-segment) KV tiles.
    seq_lens = (256, 128)
    T = sum(seq_lens)
    hidden = 64
    nH, nKV = 4, 2
    D = hidden // nH
    rope_theta = 10000.0

    cu_seqlens = jnp.array([0, seq_lens[0], T], dtype=jnp.int32)
    max_s = max(seq_lens)

    # rotary cos/sin (positions restart per sequence), torch-shaped [T, 1, D//2]
    positions = jnp.concatenate(
        [jnp.arange(l, dtype=jnp.float32) for l in seq_lens]
    )
    inv_freq = 1.0 / (rope_theta ** (jnp.arange(0, D, 2, dtype=jnp.float32) / D))
    freqs = positions[:, None] * inv_freq[None, :]          # [T, D//2]
    cos = jnp.cos(freqs)[:, None, :]
    sin = jnp.sin(freqs)[:, None, :]

    hidden_states = jax.random.normal(k_hs, (T, hidden), jnp.float32) * 0.1

    module = FlashLlamaAttentionPallas(hidden, nH, nKV, k_mod)

    out, layer_past = module.forward(hidden_states, cos, sin, cu_seqlens, max_s)
    jax.block_until_ready(out)
    jax.block_until_ready(layer_past)

    # verify against pure-JAX reference
    tok = jnp.arange(T, dtype=jnp.int32)
    seg_ids = jnp.sum(tok[:, None] >= cu_seqlens[None, 1:], axis=1).astype(jnp.int32)
    c = cos.reshape(T, D // 2).astype(jnp.float32)
    s = sin.reshape(T, D // 2).astype(jnp.float32)
    cos_full = jnp.concatenate([c, c], axis=-1)
    sin_signed = jnp.concatenate([-s, s], axis=-1)
    ref = reference_forward(
        hidden_states, module.w_qkv_t, module.w_o_t, cos_full, sin_signed, seg_ids,
        nH, nKV, D, module.softmax_scale,
    )
    assert out.shape == (T, hidden)
    assert layer_past.shape == (T, 2, nKV, D)
    max_err = float(jnp.max(jnp.abs(out - ref)))
    assert jnp.allclose(out, ref, rtol=3e-2, atol=2e-2), max_err

    print("KERNEL_OK")
</pallas_src>

<mosaic_0001>
module attributes {stable_mosaic.version = 11 : i64} {
  func.func @_matmul_kernel(%arg0: i32, %arg1: i32, %arg2: i32, %arg3: memref<128x64xbf16, #tpu.memory_space<vmem>>, %arg4: memref<64x128xbf16, #tpu.memory_space<vmem>>, %arg5: memref<128x128xbf16, #tpu.memory_space<vmem>>, %arg6: memref<128x128xf32, #tpu.memory_space<vmem>>) attributes {dimension_semantics = [#tpu.dimension_semantics<parallel>, #tpu.dimension_semantics<parallel>, #tpu.dimension_semantics<arbitrary>], iteration_bounds = array<i64: 3, 1, 1>, scalar_prefetch = 0 : i64, scratch_operands = 1 : i64, tpu.core_type = #tpu.core_type<tc>, window_params = [{transform_indices = @transform_0, window_bounds = array<i64: 128, 64>}, {transform_indices = @transform_1, window_bounds = array<i64: 64, 128>}, {transform_indices = @transform_2, window_bounds = array<i64: 128, 128>}]} {
    %c0_i32 = arith.constant 0 : i32
    %0 = arith.cmpi eq, %arg2, %c0_i32 : i32
    %1 = arith.extui %0 : i1 to i32
    %c0_i32_0 = arith.constant 0 : i32
    %2 = arith.cmpi ne, %1, %c0_i32_0 : i32
    scf.if %2 {
      %cst_10 = arith.constant 0.000000e+00 : f32
      %12 = vector.broadcast %cst_10 : f32 to vector<128x128xf32>
      %c0_11 = arith.constant 0 : index
      %c0_12 = arith.constant 0 : index
      %13 = vector.load %arg6[%c0_11, %c0_12] : memref<128x128xf32, #tpu.memory_space<vmem>>, vector<128x128xf32>
      tpu.vector_store %arg6[%c0_11, %c0_12], %12 {strides = array<i32>} : memref<128x128xf32, #tpu.memory_space<vmem>>, vector<128x128xf32>,
    } else {
    }
    %c0 = arith.constant 0 : index
    %c0_1 = arith.constant 0 : index
    %3 = vector.load %arg6[%c0, %c0_1] : memref<128x128xf32, #tpu.memory_space<vmem>>, vector<128x128xf32>
    %c0_2 = arith.constant 0 : index
    %c0_3 = arith.constant 0 : index
    %4 = vector.load %arg3[%c0_2, %c0_3] : memref<128x64xbf16, #tpu.memory_space<vmem>>, vector<128x64xbf16>
    %c0_4 = arith.constant 0 : index
    %c0_5 = arith.constant 0 : index
    %5 = vector.load %arg4[%c0_4, %c0_5] : memref<64x128xbf16, #tpu.memory_space<vmem>>, vector<64x128xbf16>
    %cst = arith.constant dense<0.000000e+00> : vector<128x128xf32>
    %6 = tpu.matmul %4, %5, %cst {dimension_numbers = #tpu.dot_dimension_numbers<[1], [0], [0], [1], [0, 0, 1, 1], [], []>} : vector<128x64xbf16>, vector<64x128xbf16>, vector<128x128xf32> -> vector<128x128xf32>
    %7 = arith.addf %3, %6 : vector<128x128xf32>
    %c0_6 = arith.constant 0 : index
    %c0_7 = arith.constant 0 : index
    %8 = vector.load %arg6[%c0_6, %c0_7] : memref<128x128xf32, #tpu.memory_space<vmem>>, vector<128x128xf32>
    tpu.vector_store %arg6[%c0_6, %c0_7], %7 {strides = array<i32>} : memref<128x128xf32, #tpu.memory_space<vmem>>, vector<128x128xf32>,
    %c0_i32_8 = arith.constant 0 : i32
    %9 = arith.cmpi eq, %arg2, %c0_i32_8 : i32
    %10 = arith.extui %9 : i1 to i32
    %c0_i32_9 = arith.constant 0 : i32
    %11 = arith.cmpi ne, %10, %c0_i32_9 : i32
    scf.if %11 {
      %c0_10 = arith.constant 0 : index
      %c0_11 = arith.constant 0 : index
      %12 = vector.load %arg6[%c0_10, %c0_11] : memref<128x128xf32, #tpu.memory_space<vmem>>, vector<128x128xf32>
      %13 = arith.truncf %12 : vector<128x128xf32> to vector<128x128xbf16>
      %c0_12 = arith.constant 0 : index
      %c0_13 = arith.constant 0 : index
      %14 = vector.load %arg5[%c0_12, %c0_13] : memref<128x128xbf16, #tpu.memory_space<vmem>>, vector<128x128xbf16>
      tpu.vector_store %arg5[%c0_12, %c0_13], %13 {strides = array<i32>} : memref<128x128xbf16, #tpu.memory_space<vmem>>, vector<128x128xbf16>,
    } else {
    }
    return
  }
  func.func @transform_0(%arg0: i32, %arg1: i32, %arg2: i32) -> (i32, i32) {
    %c0_i32 = arith.constant 0 : i32
    return %arg0, %arg2 : i32, i32
  }
  func.func @transform_1(%arg0: i32, %arg1: i32, %arg2: i32) -> (i32, i32) {
    %c0_i32 = arith.constant 0 : i32
    return %arg2, %arg1 : i32, i32
  }
  func.func @transform_2(%arg0: i32, %arg1: i32, %arg2: i32) -> (i32, i32) {
    %c0_i32 = arith.constant 0 : i32
    return %arg0, %arg1 : i32, i32
  }
}

</mosaic_0001>

<bundles_post_ra>
// kernel: tpu_custom_call.1
= control target key start
LH: loop header
LB: loop body
LE: loop exit
PB: predicated region body
PF: predicated region fallthrough
CT: control target
= control target key end

     0   :  { %7 = vsyncpa [#allocation4], 0  ;;  %s1162_s0 = inlined_call_operand.vmem [shape: bf16[384,64], index: 0, kind: input, shape index: {}]   ;;  %s1163_s1 = inlined_call_operand.vmem [shape: bf16[64,128], index: 1, kind: input, shape index: {}]   ;;  %s1164_s2 = inlined_call_operand.hbm [shape: bf16[384,128], index: 2, kind: output, shape index: {}]  }
   0x1   :  { %9 = vsyncpa [#allocation4 + $0x1], 0  ;;  %s1024_s9 = smov 0   ;;  %s1026_s10 = smov 0  }
   0x2   :  { %s1028_s11 = smov 0   ;;  %s1030_s12 = smov 0  }
   0x3   :  { %s1032_s13 = smov 0   ;;  %s1034_s14 = smov 0  }
   0x4 LB: > { %s699_s15 = sadd.s32 4294967295, %s1004_s14   ;;  %s700_s16 = sadd.s32 4294967294, %s1004_s14   ;;  %s1004_s14 = sphi %s1034_s14, %s15_s14   ;;  %s1000_s13 = sphi %s1032_s13, %s1171_s13   ;;  %s996_s12 = sphi %s1030_s12, %s1170_s12   ;;  %s992_s11 = sphi %s1028_s11, %s1169_s11   ;;  %s988_s10 = sphi %s1026_s10, %s1168_s10   ;;  %s984_s9 = sphi %s1024_s9, %s1167_s9  }
   0x5   : > { %s34_s17 = sadd.s32 1, %s1000_s13  ;;  %s99_s18 = sadd.s32 1, %s992_s11 }
   0x6   : > { %p36_p0 = scmp.ge.s32.totalorder %s34_s17, 3  ;;  %p109_p1 = scmp.ne.s32.totalorder %s992_s11, %s988_s10 }
   0x7   : > { %p110_p2 = scmp.eq.s32.totalorder %s699_s15, 2  ;;  %p115_p3 = scmp.ne.s32.totalorder %s988_s10, %s984_s9 }
   0x8   : > { %s1173_s17 = smov (%p36_p0, %s34_s17), 0  ;;  %p116_p5 = scmp.eq.s32.totalorder %s700_s16, 2 }
   0x9   : > { %p1064_p4 = por %p110_p2, %p109_p1  ;;  %s94_s20 = ssub.s32 %s1000_s13, %s1173_s17 }
   0xa   : > { %p704_p6 = scmp.ge.s32.totalorder %s1004_s14, 1  ;;  %p97_p7 = scmp.eq.s32.totalorder %s94_s20, 0 }
   0xb   : > { %p1071_p8 = por %p116_p5, %p115_p3  ;;  %p158_p9 = scmp.lt.s32.totalorder %s1004_s14, 4 }
   0xc   : > { %s1077_s22 = scalar_select %p97_p7, %s992_s11, %s99_s18  }
   0xd   : > { %p159_p10 = pnand %p704_p6, %p158_p9 }
   0xe   : > { %v914_v0 = vld [vmem:[%s1163_s1] sm:$0xff] (!%p159_p10)   ;;  %s706_s25 = sshll.u32 (!%p159_p10), %s996_s12, 4  ;;  %v915_v1 = vld [vmem:[%s1163_s1 + $0x8] sm:$0xff] (!%p159_p10)   ;;  %v916_v2 = vld [vmem:[%s1163_s1 + $0x10] sm:$0xff] (!%p159_p10)   ;;  %vm335_vm0 = vcmask (!%p159_p10), 523264   ;;  %s188_s8 = sand.u32 (!%p159_p10), 1, %s988_s10  }
   0xf   : > { %162 = sbr.rel (%p159_p10) target bundleno = 271 (0x10f), region = 28  ;;  %p192_p11 = scmp.lt.s32.totalorder (!%p159_p10), %s706_s25, 47  ;;  %825 = vmatprep.subr.bf16.mxu0 (!%p159_p10), %v914_v0  ;;  %849 = vmatprep.subr.bf16.mxu1 (!%p159_p10), %v914_v0  ;;  %v917_v3 = vld [vmem:[%s1163_s1 + $0x18] sm:$0xff] (!%p159_p10)  }
  0x10   : > { %826 = vmatpush3.bf16.msra.mxu0 (!%p159_p10), %v914_v0  ;;  %853 = vmatpush3.bf16.msra.mxu1 (!%p159_p10), %v914_v0  ;;  %s705_s15 = sshll.u32 (!%p159_p10), %s188_s8, 6  ;;  %s765_s18 = sshll.u32 (!%p159_p10), %s996_s12, 10 }
  0x11   : > { %827 = vmatprep.subr.bf16.mxu0 (!%p159_p10), %v915_v1  ;;  %850 = vmatprep.subr.bf16.mxu1 (!%p159_p10), %v915_v1  ;;  %s190_s16 = scalar_lea.vmem (!%p159_p10), [#allocation3], %s705_s15  ;;  %s1116_s12 = scalar_lea.sflag (!%p159_p10), [#allocation4], %s188_s8 }
  0x12   : > { %s603_s20 = sshll.u32 (!%p159_p10), %s190_s16, 4  ;;  %s1006_s27 = smov (!%p159_p10), [#allocation3]   ;;  %s1112_s20 = int_to_ptr.vmem [resolvable:$true] %s603_s20 }
  0x13   : > { %s926_s26 = scalar_lea.vmem (!%p159_p10), %s1112_s20, 1024  ;;  %s930_s28 = sshll.u32 (!%p159_p10), %s1006_s27, 4  ;;  %s931_s28 = int_to_ptr.vmem [resolvable:$false] %s930_s28 }
  0x14   : > { %828 = vmatpush3.bf16.msra.mxu0 (!%p159_p10), %v915_v1  ;;  %854 = vmatpush3.bf16.msra.mxu1 (!%p159_p10), %v915_v1  ;;  %p927_p12 = scmp.ne.s32.totalorder (!%p159_p10), %s1112_s20, %s926_s26  ;;  %s932_s29 = scalar_lea.vmem (!%p159_p10), %s931_s28, 2048 }
  0x15   : > { %829 = vmatprep.subr.bf16.mxu0 (!%p159_p10), %v916_v2  ;;  %851 = vmatprep.subr.bf16.mxu1 (!%p159_p10), %v916_v2  ;;  %p933_p1 = scmp.lt.s32.totalorder (!%p159_p10), %s1112_s20, %s931_s28  ;;  %p934_p2 = scmp.lt.s32.totalorder (!%p159_p10), %s932_s29, %s926_s26 }
  0x16   : > { %s1175_s25 = smov (!%p192_p11, %s706_s25), 47  ;;  %p928_p13 = pnand %p927_p12, %p1064_p4 }
  0x17   : > { %s707_s30 = sshll.u32 %s1175_s25, 2  ;;  %s1110_s25 = scalar_lea.hbm %s1164_s2, %s765_s18 }
  0x18   : > { %s198_s7 = scalar_lea.vmem %s1162_s0, %s707_s30  ;;  %830 = vmatpush3.bf16.msra.mxu0 %v916_v2  ;;  %855 = vmatpush3.bf16.msra.mxu1 %v916_v2  ;;  %p929_p0 = pneg %p928_p13 }
  0x19   : > { %v918_v4 = vld [vmem:[%s198_s7] sm:$0xff]   ;;  %831 = vmatprep.subr.bf16.mxu0 %v917_v3  ;;  %852 = vmatprep.subr.bf16.mxu1 %v917_v3  ;;  %v920_v6 = vld [vmem:[%s198_s7 + $0x8] sm:$0xff]   ;;  %v922_v8 = vld [vmem:[%s198_s7 + $0x10] sm:$0xff]   ;;  %p935_p3 = por %p934_p2, %p933_p1 }
  0x1a   : > { %v919_v5 = vld [vmem:[%s198_s7 + $0x20] sm:$0xff]   ;;  %833 = vmatprep.mubr.msk.bf16.mxu0 %vm335_vm0, %v918_v4  ;;  %v921_v7 = vld [vmem:[%s198_s7 + $0x28] sm:$0xff]   ;;  %v923_v9 = vld [vmem:[%s198_s7 + $0x30] sm:$0xff]  }
  0x1b   : > { %841 = vmatprep.mubr.msk.bf16.mxu1 %vm335_vm0, %v919_v5  ;;  %v924_v10 = vld [vmem:[%s198_s7 + $0x18] sm:$0xff]   ;;  %p936_p5 = pnand %p935_p3, %p929_p0 }
  0x1c   : > { %832 = vmatpush3.bf16.msra.mxu0 %v917_v3  ;;  %856 = vmatpush3.bf16.msra.mxu1 %v917_v3  ;;  %v925_v11 = vld [vmem:[%s198_s7 + $0x38] sm:$0xff]  }
  0x1f   : > { %834 = vmatmul.mubr.msk.bf16.vlgmr.msra.gmra.mrb[0].mxu0 %vm335_vm0, %v920_v6  ;;  %842 = vmatmul.mubr.msk.bf16.vlgmr.msra.gmra.mrb[0].mxu1 %vm335_vm0, %v921_v7 }
  0x20   : > { %837 = vmatprep.mubr.msk.bf16.mxu0 %vm335_vm0, %v922_v8  ;;  %845 = vmatprep.mubr.msk.bf16.mxu1 %vm335_vm0, %v923_v9 }
  0x27   : > { %838 = vmatmul.mubr.msk.bf16.gmra.mrb[4].mxu0 %vm335_vm0, %v924_v10  ;;  %846 = vmatmul.mubr.msk.bf16.gmra.mrb[4].mxu1 %vm335_vm0, %v925_v11 }
  0xf2   : > { %v835_v12 = vpop.f32.mrb[0].mxu0  ;;  %v843_v13 = vpop.f32.mrb[0].mxu1 }
  0xf3   : > { %v394_v14 = vpop.f32.mrb[1].mxu0  ;;  %v426_v15 = vpop.f32.mrb[1].mxu1 }
  0xf4   : > { %v836_v16 = vpop.f32.mrb[2].mxu0  ;;  %v844_v17 = vpop.f32.mrb[2].mxu1 }
  0xf5   : > { %v774_v18 = vpack.c.bf16 %v836_v16, %v835_v12  ;;  %v794_v19 = vpack.c.bf16 %v844_v17, %v843_v13  ;;  %v397_v20 = vpop.f32.mrb[3].mxu0  ;;  %v429_v21 = vpop.f32.mrb[3].mxu1 }
  0xf6   : > { %v769_v22 = vpack.c.bf16 %v397_v20, %v394_v14  ;;  %v789_v23 = vpack.c.bf16 %v429_v21, %v426_v15 }
  0xf7   : > { %806 = vst [vmem:[%s190_s16 + $0x8] sm:$0xff] %v774_v18   ;;  %810 = vst [vmem:[%s190_s16 + $0x28] sm:$0xff] %v794_v19  }
  0xf8   : > { %770 = vst [vmem:[%s190_s16] sm:$0xff] %v769_v22   ;;  %809 = vst [vmem:[%s190_s16 + $0x20] sm:$0xff] %v789_v23  }
  0xfa   : > { %v839_v24 = vpop.f32.mrb[4].mxu0  ;;  %v847_v25 = vpop.f32.mrb[4].mxu1 }
  0xfb   : > { %v410_v26 = vpop.f32.mrb[5].mxu0  ;;  %v442_v27 = vpop.f32.mrb[5].mxu1 }
  0xfc   : > { %v840_v28 = vpop.f32.mrb[6].mxu0  ;;  %v848_v29 = vpop.f32.mrb[6].mxu1 }
  0xfd   : > { %v784_v30 = vpack.c.bf16 %v840_v28, %v839_v24  ;;  %v804_v31 = vpack.c.bf16 %v848_v29, %v847_v25  ;;  %v413_v32 = vpop.f32.mrb[7].mxu0  ;;  %v445_v33 = vpop.f32.mrb[7].mxu1 }
  0xfe   : > { %v779_v34 = vpack.c.bf16 %v413_v32, %v410_v26  ;;  %v799_v35 = vpack.c.bf16 %v445_v33, %v442_v27 }
  0xff   : > { %808 = vst [vmem:[%s190_s16 + $0x18] sm:$0xff] %v784_v30   ;;  %812 = vst [vmem:[%s190_s16 + $0x38] sm:$0xff] %v804_v31  }
 0x100   : > { %807 = vst [vmem:[%s190_s16 + $0x10] sm:$0xff] %v779_v34   ;;  %811 = vst [vmem:[%s190_s16 + $0x30] sm:$0xff] %v799_v35  }
 0x101   : > { %939 = shalt.err (!%p936_p5)
}
 0x102   : > { %s940_s30 = scalar_lea.hbm %s1110_s25, 1024  ;;  %s944_s5 = scalar_lea.hbm %s1164_s2, 3072 }
 0x103   : > { %p941_p6 = scmp.ne.s32.totalorder %s1110_s25, %s940_s30  ;;  %p945_p10 = scmp.lt.u32.totalorder %s1110_s25, %s1164_s2 }
 0x104   : > { %p946_p11 = scmp.lt.u32.totalorder %s944_s5, %s940_s30  ;;  %p948_p13 = scmp.lt.u32.totalorder %s940_s30, %s1110_s25 }
 0x105   : > { %p942_p7 = pnand %p941_p6, %p1064_p4 }
 0x106   : > { %p947_p12 = por %p946_p11, %p945_p10 }
 0x107   : > { %p943_p9 = pneg %p942_p7 }
 0x108   : > { %p949_p0 = por %p948_p13, %p947_p12 }
 0x10a   : > { %p950_p1 = pnand %p949_p0, %p943_p9 }
 0x10c   : > { %953 = shalt.err (!%p950_p1)
}
 0x10d   : > { %s1007_s8 = smov 64   ;;  %s1008_s15 = smov 4  }
 0x10e   : > { %857 = dma.vmem_to_hbm [thread:$0]  (%p1064_p4), %s1112_s20, 1024, %s1110_s25, %s1116_s12, %s1007_s8, %s1007_s8, %s1008_s15  }
 0x10f PF: > { %p863_p2 = scmp.ge.s32.totalorder %s1004_s14, 2  ;;  %s618_s16 = sand.u32 1, %s984_s9  }
 0x110   : > { %s619_s18 = scalar_lea.sflag [#allocation4], %s618_s16 }
 0x111   : > { %p860_p3 = pnand %p863_p2, %p1071_p8 }
 0x113   : > { %979 = dma.done.wait (!%p860_p3), %s619_s18, 1024  }
 0x114   : > { %981 = vsyncadd (!%p860_p3), %s619_s18, 4294966272  ;;  %s15_s14 = sadd.s32 1, %s1004_s14   ;;  %s1167_s9 = smov %s988_s10 }
 0x115   : > { %p12_p5 = scmp.ge.s32.totalorder %s15_s14, 5   ;;  %s1168_s10 = smov %s992_s11 }
 0x116   : > { %s1169_s11 = smov %s1077_s22  ;;  %s1170_s12 = smov %s1000_s13 }
 0x117   : > { %s1171_s13 = smov %s1173_s17  ;;  %14 = sbr.rel (!%p12_p5) target bundleno = 4 (0x4), region = 74 }
 0x11e   :  { %624 = vsyncpa [#allocation4], 1 }
 0x11f   :  { %626 = vsyncpa [#allocation4 + $0x1], 1 }

</bundles_post_ra>
